<compile_context>
chip_gen: v7x
topology: tpu7x:2x2x1
jax: 0.10.0
libtpu: 0.0.40
codegen_flags: <defaults>
</compile_context>

<pallas_src>
import functools

import jax
import jax.numpy as jnp
from jax.experimental import pallas as pl
from jax.experimental.pallas import tpu as pltpu

# ---------------- model hyper-parameters (small, consistent with module) ----
DIM = 32          # token embedding dim
HEADS = 2         # number of attention heads
DIM_HEAD = 16     # per-head dim
INNER = HEADS * DIM_HEAD   # 32
SEQ = 8           # number of tokens
BATCH = 2
SCALE = DIM_HEAD ** (-0.5)


def attention_kernel(x_ref, wq_ref, wk_ref, wv_ref, wo_ref, o_ref, *, batch, seq):
    """Whole problem in one invocation (no grid).

    x_ref:  (batch*seq, DIM)          bf16  VMEM
    wq_ref: (HEADS, DIM, DIM_HEAD)    bf16  VMEM  (softmax scale pre-folded)
    wk_ref: (HEADS, DIM, DIM_HEAD)    bf16  VMEM
    wv_ref: (HEADS, DIM, DIM_HEAD)    bf16  VMEM
    wo_ref: (HEADS, DIM_HEAD, DIM)    bf16  VMEM
    o_ref:  (batch*seq, DIM)          f32   VMEM
    """
    heads = wq_ref.shape[0]
    x = x_ref[...]                                            # (batch*seq, DIM) bf16

    # Per-head projections over the full batch-flattened token matrix.
    # bf16 x bf16 MXU matmuls with f32 accumulation; results at lane offset 0.
    q = [jnp.dot(x, wq_ref[h], preferred_element_type=jnp.float32) for h in range(heads)]
    k = [jnp.dot(x, wk_ref[h], preferred_element_type=jnp.float32) for h in range(heads)]
    v = [jnp.dot(x, wv_ref[h], preferred_element_type=jnp.float32) for h in range(heads)]

    ys = []
    for b in range(batch):                                    # static, unrolled
        sl = slice(b * seq, (b + 1) * seq)                    # sublane-aligned (seq=8)
        head_outs = []
        for h in range(heads):                                # static, unrolled
            q_bh = q[h][sl]                                   # (seq, DIM_HEAD) f32
            k_bh = k[h][sl]
            v_bh = v[h][sl]

            # scores = q @ k^T (scale already folded into wq), no transpose op
            dots = jax.lax.dot_general(
                q_bh, k_bh, (((1,), (1,)), ((), ())),
                preferred_element_type=jnp.float32)           # (seq, seq)

            # numerically stable softmax in f32
            m = jnp.max(dots, axis=-1, keepdims=True)
            e = jnp.exp(dots - m)
            s = jnp.sum(e, axis=-1, keepdims=True)
            attn = e * pl.reciprocal(s, approx=True)          # EUP recip + VPU mul

            out_bh = jnp.dot(attn, v_bh,
                             preferred_element_type=jnp.float32)   # (seq, DIM_HEAD)

            # per-head output projection block; summing avoids lane concat
            head_outs.append(
                jnp.dot(out_bh, wo_ref[h].astype(jnp.float32),
                        preferred_element_type=jnp.float32))       # (seq, DIM)

        y_b = head_outs[0]
        for t in head_outs[1:]:
            y_b = y_b + t
        ys.append(y_b)

    # single store of the whole result
    o_ref[...] = jnp.concatenate(ys, axis=0).astype(o_ref.dtype)


def prepare_params(w_qkv, w_out, heads=HEADS, dim_head=DIM_HEAD):
    """Host-side, one-time weight prep: split qkv per head, fold scale, cast bf16."""
    in_dim = w_qkv.shape[0]
    out_dim = w_out.shape[-1]
    w_q, w_k, w_v = jnp.split(w_qkv, 3, axis=-1)              # each (in_dim, INNER)
    w_q = w_q * SCALE                                         # fold softmax scale into Q

    def split_heads(w):                                       # (in_dim, H*Dh) -> (H, in_dim, Dh)
        return w.reshape(in_dim, heads, dim_head).transpose(1, 0, 2).astype(jnp.bfloat16)

    wo = w_out.reshape(heads, dim_head, out_dim).astype(jnp.bfloat16)
    return split_heads(w_q), split_heads(w_k), split_heads(w_v), wo


def attention_forward(x, w_qkv, w_out):
    b, n, d = x.shape
    wq, wk, wv, wo = prepare_params(w_qkv, w_out)
    x_flat = x.reshape(b * n, d).astype(jnp.bfloat16)         # halves HBM->VMEM bytes

    kernel = functools.partial(attention_kernel, batch=b, seq=n)
    y = pl.pallas_call(
        kernel,
        out_shape=jax.ShapeDtypeStruct((b * n, d), jnp.float32),
        in_specs=[pl.BlockSpec(memory_space=pltpu.MemorySpace.VMEM)] * 5,
        out_specs=pl.BlockSpec(memory_space=pltpu.MemorySpace.VMEM),
    )(x_flat, wq, wk, wv, wo)
    return y.reshape(b, n, d)


# ----------------------------- references -----------------------------------
def attention_reference_f32(x, w_qkv, w_out):
    """Pure-JAX f32 reference mirroring the PyTorch forward (mask=None)."""
    b, n, _ = x.shape
    qkv = jnp.einsum('bnd,de->bne', x, w_qkv)
    q, k, v = jnp.split(qkv, 3, axis=-1)

    def to_heads(t):
        return t.reshape(b, n, HEADS, DIM_HEAD).transpose(0, 2, 1, 3)

    q, k, v = map(to_heads, (q, k, v))
    dots = jnp.einsum('bhid,bhjd->bhij', q, k) * SCALE
    attn = jax.nn.softmax(dots, axis=-1)
    out = jnp.einsum('bhij,bhjd->bhid', attn, v)
    out = out.transpose(0, 2, 1, 3).reshape(b, n, INNER)
    return jnp.einsum('bne,ed->bnd', out, w_out)


def attention_reference_matched(x_flat, wq, wk, wv, wo, batch, seq):
    """Same math / same bf16-rounded operands as the kernel (f32 accumulation)."""
    h, _, dh = wq.shape
    xf = x_flat.astype(jnp.float32)
    q = jnp.einsum('td,hdk->htk', xf, wq.astype(jnp.float32)).reshape(h, batch, seq, dh)
    k = jnp.einsum('td,hdk->htk', xf, wk.astype(jnp.float32)).reshape(h, batch, seq, dh)
    v = jnp.einsum('td,hdk->htk', xf, wv.astype(jnp.float32)).reshape(h, batch, seq, dh)
    dots = jnp.einsum('hbik,hbjk->hbij', q, k)                # scale folded into wq
    attn = jax.nn.softmax(dots, axis=-1)
    out = jnp.einsum('hbij,hbjk->hbik', attn, v)
    y = jnp.einsum('hbik,hko->bio', out, wo.astype(jnp.float32))
    return y.reshape(batch, seq, -1)


if __name__ == "__main__":
    key = jax.random.PRNGKey(0)
    kx, kq, ko = jax.random.split(key, 3)

    x = jax.random.normal(kx, (BATCH, SEQ, DIM), dtype=jnp.float32)
    # Synthetic weights with PyTorch-equivalent shapes, stored transposed as (in, out).
    w_qkv = jax.random.normal(kq, (DIM, 3 * INNER), dtype=jnp.float32) * (DIM ** -0.5)
    w_out = jax.random.normal(ko, (INNER, DIM), dtype=jnp.float32) * (INNER ** -0.5)

    out = jax.block_until_ready(attention_forward(x, w_qkv, w_out))
    assert out.shape == (BATCH, SEQ, DIM)

    # 1) matched-precision reference (same bf16 operands): tight-ish tolerance
    wq, wk, wv, wo = prepare_params(w_qkv, w_out)
    x_flat = x.reshape(BATCH * SEQ, DIM).astype(jnp.bfloat16)
    ref_m = attention_reference_matched(x_flat, wq, wk, wv, wo, BATCH, SEQ)
    assert jnp.allclose(out, ref_m, atol=2e-2, rtol=2e-2), "mismatch vs matched-precision reference"

    # 2) full-f32 module-semantics reference: loose tolerance (bf16 MXU operands)
    ref_f = attention_reference_f32(x, w_qkv, w_out)
    assert jnp.allclose(out, ref_f, atol=1e-1, rtol=1e-1), "mismatch vs f32 reference"

    print("KERNEL_OK")
</pallas_src>

<mosaic_0001>
module attributes {stable_mosaic.version = 11 : i64} {
  func.func @attention_kernel(%arg0: memref<16x32xbf16, #tpu.memory_space<vmem>>, %arg1: memref<2x32x16xbf16, #tpu.memory_space<vmem>>, %arg2: memref<2x32x16xbf16, #tpu.memory_space<vmem>>, %arg3: memref<2x32x16xbf16, #tpu.memory_space<vmem>>, %arg4: memref<2x16x32xbf16, #tpu.memory_space<vmem>>, %arg5: memref<16x32xf32, #tpu.memory_space<vmem>>) attributes {dimension_semantics = [], scalar_prefetch = 0 : i64, scratch_operands = 0 : i64, tpu.core_type = #tpu.core_type<tc>} {
    %c0 = arith.constant 0 : index
    %c0_0 = arith.constant 0 : index
    %0 = vector.load %arg0[%c0, %c0_0] : memref<16x32xbf16, #tpu.memory_space<vmem>>, vector<16x32xbf16>
    %c0_1 = arith.constant 0 : index
    %c0_2 = arith.constant 0 : index
    %c0_3 = arith.constant 0 : index
    %1 = vector.load %arg1[%c0_1, %c0_2, %c0_3] : memref<2x32x16xbf16, #tpu.memory_space<vmem>>, vector<1x32x16xbf16>
    %2 = vector.shape_cast %1 : vector<1x32x16xbf16> to vector<32x16xbf16>
    %cst = arith.constant dense<0.000000e+00> : vector<16x16xf32>
    %3 = tpu.matmul %0, %2, %cst {dimension_numbers = #tpu.dot_dimension_numbers<[1], [0], [0], [1], [0, 0, 1, 1], [], []>} : vector<16x32xbf16>, vector<32x16xbf16>, vector<16x16xf32> -> vector<16x16xf32>
    %c1 = arith.constant 1 : index
    %c0_4 = arith.constant 0 : index
    %c0_5 = arith.constant 0 : index
    %4 = vector.load %arg1[%c1, %c0_4, %c0_5] : memref<2x32x16xbf16, #tpu.memory_space<vmem>>, vector<1x32x16xbf16>
    %5 = vector.shape_cast %4 : vector<1x32x16xbf16> to vector<32x16xbf16>
    %cst_6 = arith.constant dense<0.000000e+00> : vector<16x16xf32>
    %6 = tpu.matmul %0, %5, %cst_6 {dimension_numbers = #tpu.dot_dimension_numbers<[1], [0], [0], [1], [0, 0, 1, 1], [], []>} : vector<16x32xbf16>, vector<32x16xbf16>, vector<16x16xf32> -> vector<16x16xf32>
    %c0_7 = arith.constant 0 : index
    %c0_8 = arith.constant 0 : index
    %c0_9 = arith.constant 0 : index
    %7 = vector.load %arg2[%c0_7, %c0_8, %c0_9] : memref<2x32x16xbf16, #tpu.memory_space<vmem>>, vector<1x32x16xbf16>
    %8 = vector.shape_cast %7 : vector<1x32x16xbf16> to vector<32x16xbf16>
    %cst_10 = arith.constant dense<0.000000e+00> : vector<16x16xf32>
    %9 = tpu.matmul %0, %8, %cst_10 {dimension_numbers = #tpu.dot_dimension_numbers<[1], [0], [0], [1], [0, 0, 1, 1], [], []>} : vector<16x32xbf16>, vector<32x16xbf16>, vector<16x16xf32> -> vector<16x16xf32>
    %c1_11 = arith.constant 1 : index
    %c0_12 = arith.constant 0 : index
    %c0_13 = arith.constant 0 : index
    %10 = vector.load %arg2[%c1_11, %c0_12, %c0_13] : memref<2x32x16xbf16, #tpu.memory_space<vmem>>, vector<1x32x16xbf16>
    %11 = vector.shape_cast %10 : vector<1x32x16xbf16> to vector<32x16xbf16>
    %cst_14 = arith.constant dense<0.000000e+00> : vector<16x16xf32>
    %12 = tpu.matmul %0, %11, %cst_14 {dimension_numbers = #tpu.dot_dimension_numbers<[1], [0], [0], [1], [0, 0, 1, 1], [], []>} : vector<16x32xbf16>, vector<32x16xbf16>, vector<16x16xf32> -> vector<16x16xf32>
    %c0_15 = arith.constant 0 : index
    %c0_16 = arith.constant 0 : index
    %c0_17 = arith.constant 0 : index
    %13 = vector.load %arg3[%c0_15, %c0_16, %c0_17] : memref<2x32x16xbf16, #tpu.memory_space<vmem>>, vector<1x32x16xbf16>
    %14 = vector.shape_cast %13 : vector<1x32x16xbf16> to vector<32x16xbf16>
    %cst_18 = arith.constant dense<0.000000e+00> : vector<16x16xf32>
    %15 = tpu.matmul %0, %14, %cst_18 {dimension_numbers = #tpu.dot_dimension_numbers<[1], [0], [0], [1], [0, 0, 1, 1], [], []>} : vector<16x32xbf16>, vector<32x16xbf16>, vector<16x16xf32> -> vector<16x16xf32>
    %c1_19 = arith.constant 1 : index
    %c0_20 = arith.constant 0 : index
    %c0_21 = arith.constant 0 : index
    %16 = vector.load %arg3[%c1_19, %c0_20, %c0_21] : memref<2x32x16xbf16, #tpu.memory_space<vmem>>, vector<1x32x16xbf16>
    %17 = vector.shape_cast %16 : vector<1x32x16xbf16> to vector<32x16xbf16>
    %cst_22 = arith.constant dense<0.000000e+00> : vector<16x16xf32>
    %18 = tpu.matmul %0, %17, %cst_22 {dimension_numbers = #tpu.dot_dimension_numbers<[1], [0], [0], [1], [0, 0, 1, 1], [], []>} : vector<16x32xbf16>, vector<32x16xbf16>, vector<16x16xf32> -> vector<16x16xf32>
    %19 = vector.extract_strided_slice %3 {offsets = [0, 0], sizes = [8, 16], strides = [1, 1]} : vector<16x16xf32> to vector<8x16xf32>
    %20 = vector.extract_strided_slice %9 {offsets = [0, 0], sizes = [8, 16], strides = [1, 1]} : vector<16x16xf32> to vector<8x16xf32>
    %21 = vector.extract_strided_slice %15 {offsets = [0, 0], sizes = [8, 16], strides = [1, 1]} : vector<16x16xf32> to vector<8x16xf32>
    %cst_23 = arith.constant dense<0.000000e+00> : vector<8x8xf32>
    %22 = tpu.matmul %19, %20, %cst_23 {dimension_numbers = #tpu.dot_dimension_numbers<[1], [1], [0], [0], [0, 0, 1, 0], [], []>} : vector<8x16xf32>, vector<8x16xf32>, vector<8x8xf32> -> vector<8x8xf32>
    %cst_24 = arith.constant dense<0xFF800000> : vector<8xf32>
    %23 = vector.multi_reduction <maximumf>, %22, %cst_24 [1] : vector<8x8xf32> to vector<8xf32>
    %24 = vector.shape_cast %23 : vector<8xf32> to vector<8x1xf32>
    %25 = vector.broadcast %24 : vector<8x1xf32> to vector<8x8xf32>
    %26 = arith.subf %22, %25 : vector<8x8xf32>
    %27 = math.exp %26 : vector<8x8xf32>
    %cst_25 = arith.constant dense<0.000000e+00> : vector<8xf32>
    %28 = vector.multi_reduction <add>, %27, %cst_25 [1] : vector<8x8xf32> to vector<8xf32>
    %29 = vector.shape_cast %28 : vector<8xf32> to vector<8x1xf32>
    %30 = tpu.reciprocal %29 {approx = true} : vector<8x1xf32> -> vector<8x1xf32>
    %31 = vector.broadcast %30 : vector<8x1xf32> to vector<8x8xf32>
    %32 = arith.mulf %27, %31 : vector<8x8xf32>
    %cst_26 = arith.constant dense<0.000000e+00> : vector<8x16xf32>
    %33 = tpu.matmul %32, %21, %cst_26 {dimension_numbers = #tpu.dot_dimension_numbers<[1], [0], [0], [1], [0, 0, 1, 1], [], []>} : vector<8x8xf32>, vector<8x16xf32>, vector<8x16xf32> -> vector<8x16xf32>
    %c0_27 = arith.constant 0 : index
    %c0_28 = arith.constant 0 : index
    %c0_29 = arith.constant 0 : index
    %34 = vector.load %arg4[%c0_27, %c0_28, %c0_29] : memref<2x16x32xbf16, #tpu.memory_space<vmem>>, vector<1x16x32xbf16>
    %35 = vector.shape_cast %34 : vector<1x16x32xbf16> to vector<16x32xbf16>
    %36 = arith.extf %35 : vector<16x32xbf16> to vector<16x32xf32>
    %cst_30 = arith.constant dense<0.000000e+00> : vector<8x32xf32>
    %37 = tpu.matmul %33, %36, %cst_30 {dimension_numbers = #tpu.dot_dimension_numbers<[1], [0], [0], [1], [0, 0, 1, 1], [], []>} : vector<8x16xf32>, vector<16x32xf32>, vector<8x32xf32> -> vector<8x32xf32>
    %38 = vector.extract_strided_slice %6 {offsets = [0, 0], sizes = [8, 16], strides = [1, 1]} : vector<16x16xf32> to vector<8x16xf32>
    %39 = vector.extract_strided_slice %12 {offsets = [0, 0], sizes = [8, 16], strides = [1, 1]} : vector<16x16xf32> to vector<8x16xf32>
    %40 = vector.extract_strided_slice %18 {offsets = [0, 0], sizes = [8, 16], strides = [1, 1]} : vector<16x16xf32> to vector<8x16xf32>
    %cst_31 = arith.constant dense<0.000000e+00> : vector<8x8xf32>
    %41 = tpu.matmul %38, %39, %cst_31 {dimension_numbers = #tpu.dot_dimension_numbers<[1], [1], [0], [0], [0, 0, 1, 0], [], []>} : vector<8x16xf32>, vector<8x16xf32>, vector<8x8xf32> -> vector<8x8xf32>
    %cst_32 = arith.constant dense<0xFF800000> : vector<8xf32>
    %42 = vector.multi_reduction <maximumf>, %41, %cst_32 [1] : vector<8x8xf32> to vector<8xf32>
    %43 = vector.shape_cast %42 : vector<8xf32> to vector<8x1xf32>
    %44 = vector.broadcast %43 : vector<8x1xf32> to vector<8x8xf32>
    %45 = arith.subf %41, %44 : vector<8x8xf32>
    %46 = math.exp %45 : vector<8x8xf32>
    %cst_33 = arith.constant dense<0.000000e+00> : vector<8xf32>
    %47 = vector.multi_reduction <add>, %46, %cst_33 [1] : vector<8x8xf32> to vector<8xf32>
    %48 = vector.shape_cast %47 : vector<8xf32> to vector<8x1xf32>
    %49 = tpu.reciprocal %48 {approx = true} : vector<8x1xf32> -> vector<8x1xf32>
    %50 = vector.broadcast %49 : vector<8x1xf32> to vector<8x8xf32>
    %51 = arith.mulf %46, %50 : vector<8x8xf32>
    %cst_34 = arith.constant dense<0.000000e+00> : vector<8x16xf32>
    %52 = tpu.matmul %51, %40, %cst_34 {dimension_numbers = #tpu.dot_dimension_numbers<[1], [0], [0], [1], [0, 0, 1, 1], [], []>} : vector<8x8xf32>, vector<8x16xf32>, vector<8x16xf32> -> vector<8x16xf32>
    %c1_35 = arith.constant 1 : index
    %c0_36 = arith.constant 0 : index
    %c0_37 = arith.constant 0 : index
    %53 = vector.load %arg4[%c1_35, %c0_36, %c0_37] : memref<2x16x32xbf16, #tpu.memory_space<vmem>>, vector<1x16x32xbf16>
    %54 = vector.shape_cast %53 : vector<1x16x32xbf16> to vector<16x32xbf16>
    %55 = arith.extf %54 : vector<16x32xbf16> to vector<16x32xf32>
    %cst_38 = arith.constant dense<0.000000e+00> : vector<8x32xf32>
    %56 = tpu.matmul %52, %55, %cst_38 {dimension_numbers = #tpu.dot_dimension_numbers<[1], [0], [0], [1], [0, 0, 1, 1], [], []>} : vector<8x16xf32>, vector<16x32xf32>, vector<8x32xf32> -> vector<8x32xf32>
    %57 = arith.addf %37, %56 : vector<8x32xf32>
    %58 = vector.extract_strided_slice %3 {offsets = [8, 0], sizes = [8, 16], strides = [1, 1]} : vector<16x16xf32> to vector<8x16xf32>
    %59 = vector.extract_strided_slice %9 {offsets = [8, 0], sizes = [8, 16], strides = [1, 1]} : vector<16x16xf32> to vector<8x16xf32>
    %60 = vector.extract_strided_slice %15 {offsets = [8, 0], sizes = [8, 16], strides = [1, 1]} : vector<16x16xf32> to vector<8x16xf32>
    %cst_39 = arith.constant dense<0.000000e+00> : vector<8x8xf32>
    %61 = tpu.matmul %58, %59, %cst_39 {dimension_numbers = #tpu.dot_dimension_numbers<[1], [1], [0], [0], [0, 0, 1, 0], [], []>} : vector<8x16xf32>, vector<8x16xf32>, vector<8x8xf32> -> vector<8x8xf32>
    %cst_40 = arith.constant dense<0xFF800000> : vector<8xf32>
    %62 = vector.multi_reduction <maximumf>, %61, %cst_40 [1] : vector<8x8xf32> to vector<8xf32>
    %63 = vector.shape_cast %62 : vector<8xf32> to vector<8x1xf32>
    %64 = vector.broadcast %63 : vector<8x1xf32> to vector<8x8xf32>
    %65 = arith.subf %61, %64 : vector<8x8xf32>
    %66 = math.exp %65 : vector<8x8xf32>
    %cst_41 = arith.constant dense<0.000000e+00> : vector<8xf32>
    %67 = vector.multi_reduction <add>, %66, %cst_41 [1] : vector<8x8xf32> to vector<8xf32>
    %68 = vector.shape_cast %67 : vector<8xf32> to vector<8x1xf32>
    %69 = tpu.reciprocal %68 {approx = true} : vector<8x1xf32> -> vector<8x1xf32>
    %70 = vector.broadcast %69 : vector<8x1xf32> to vector<8x8xf32>
    %71 = arith.mulf %66, %70 : vector<8x8xf32>
    %cst_42 = arith.constant dense<0.000000e+00> : vector<8x16xf32>
    %72 = tpu.matmul %71, %60, %cst_42 {dimension_numbers = #tpu.dot_dimension_numbers<[1], [0], [0], [1], [0, 0, 1, 1], [], []>} : vector<8x8xf32>, vector<8x16xf32>, vector<8x16xf32> -> vector<8x16xf32>
    %c0_43 = arith.constant 0 : index
    %c0_44 = arith.constant 0 : index
    %c0_45 = arith.constant 0 : index
    %73 = vector.load %arg4[%c0_43, %c0_44, %c0_45] : memref<2x16x32xbf16, #tpu.memory_space<vmem>>, vector<1x16x32xbf16>
    %74 = vector.shape_cast %73 : vector<1x16x32xbf16> to vector<16x32xbf16>
    %75 = arith.extf %74 : vector<16x32xbf16> to vector<16x32xf32>
    %cst_46 = arith.constant dense<0.000000e+00> : vector<8x32xf32>
    %76 = tpu.matmul %72, %75, %cst_46 {dimension_numbers = #tpu.dot_dimension_numbers<[1], [0], [0], [1], [0, 0, 1, 1], [], []>} : vector<8x16xf32>, vector<16x32xf32>, vector<8x32xf32> -> vector<8x32xf32>
    %77 = vector.extract_strided_slice %6 {offsets = [8, 0], sizes = [8, 16], strides = [1, 1]} : vector<16x16xf32> to vector<8x16xf32>
    %78 = vector.extract_strided_slice %12 {offsets = [8, 0], sizes = [8, 16], strides = [1, 1]} : vector<16x16xf32> to vector<8x16xf32>
    %79 = vector.extract_strided_slice %18 {offsets = [8, 0], sizes = [8, 16], strides = [1, 1]} : vector<16x16xf32> to vector<8x16xf32>
    %cst_47 = arith.constant dense<0.000000e+00> : vector<8x8xf32>
    %80 = tpu.matmul %77, %78, %cst_47 {dimension_numbers = #tpu.dot_dimension_numbers<[1], [1], [0], [0], [0, 0, 1, 0], [], []>} : vector<8x16xf32>, vector<8x16xf32>, vector<8x8xf32> -> vector<8x8xf32>
    %cst_48 = arith.constant dense<0xFF800000> : vector<8xf32>
    %81 = vector.multi_reduction <maximumf>, %80, %cst_48 [1] : vector<8x8xf32> to vector<8xf32>
    %82 = vector.shape_cast %81 : vector<8xf32> to vector<8x1xf32>
    %83 = vector.broadcast %82 : vector<8x1xf32> to vector<8x8xf32>
    %84 = arith.subf %80, %83 : vector<8x8xf32>
    %85 = math.exp %84 : vector<8x8xf32>
    %cst_49 = arith.constant dense<0.000000e+00> : vector<8xf32>
    %86 = vector.multi_reduction <add>, %85, %cst_49 [1] : vector<8x8xf32> to vector<8xf32>
    %87 = vector.shape_cast %86 : vector<8xf32> to vector<8x1xf32>
    %88 = tpu.reciprocal %87 {approx = true} : vector<8x1xf32> -> vector<8x1xf32>
    %89 = vector.broadcast %88 : vector<8x1xf32> to vector<8x8xf32>
    %90 = arith.mulf %85, %89 : vector<8x8xf32>
    %cst_50 = arith.constant dense<0.000000e+00> : vector<8x16xf32>
    %91 = tpu.matmul %90, %79, %cst_50 {dimension_numbers = #tpu.dot_dimension_numbers<[1], [0], [0], [1], [0, 0, 1, 1], [], []>} : vector<8x8xf32>, vector<8x16xf32>, vector<8x16xf32> -> vector<8x16xf32>
    %c1_51 = arith.constant 1 : index
    %c0_52 = arith.constant 0 : index
    %c0_53 = arith.constant 0 : index
    %92 = vector.load %arg4[%c1_51, %c0_52, %c0_53] : memref<2x16x32xbf16, #tpu.memory_space<vmem>>, vector<1x16x32xbf16>
    %93 = vector.shape_cast %92 : vector<1x16x32xbf16> to vector<16x32xbf16>
    %94 = arith.extf %93 : vector<16x32xbf16> to vector<16x32xf32>
    %cst_54 = arith.constant dense<0.000000e+00> : vector<8x32xf32>
    %95 = tpu.matmul %91, %94, %cst_54 {dimension_numbers = #tpu.dot_dimension_numbers<[1], [0], [0], [1], [0, 0, 1, 1], [], []>} : vector<8x16xf32>, vector<16x32xf32>, vector<8x32xf32> -> vector<8x32xf32>
    %96 = arith.addf %76, %95 : vector<8x32xf32>
    %97 = tpu.concatenate %57, %96 in 0 : vector<8x32xf32>, vector<8x32xf32> -> vector<16x32xf32>
    %c0_55 = arith.constant 0 : index
    %c0_56 = arith.constant 0 : index
    %98 = vector.load %arg5[%c0_55, %c0_56] : memref<16x32xf32, #tpu.memory_space<vmem>>, vector<16x32xf32>
    tpu.vector_store %arg5[%c0_55, %c0_56], %97 {strides = array<i32>} : memref<16x32xf32, #tpu.memory_space<vmem>>, vector<16x32xf32>,
    return
  }
}

</mosaic_0001>

<bundles_post_ra>
// kernel: tpu_custom_call.1
= control target key start
LH: loop header
LB: loop body
LE: loop exit
PB: predicated region body
PF: predicated region fallthrough
CT: control target
= control target key end

     0   :  { %v1634_v1 = vmov 0.0   ;;  %vm1635_vm0 = vmmov 0   ;;  %vm45_vm1 = vcmask 261120   ;;  %s1827_s0 = inlined_call_operand.vmem [shape: bf16[16,32], index: 0, kind: input, shape index: {}]   ;;  %s1828_s1 = inlined_call_operand.vmem [shape: bf16[2,32,16], index: 1, kind: input, shape index: {}]   ;;  %s1829_s2 = inlined_call_operand.vmem [shape: bf16[2,32,16], index: 2, kind: input, shape index: {}]   ;;  %s1830_s3 = inlined_call_operand.vmem [shape: bf16[2,32,16], index: 3, kind: input, shape index: {}]   ;;  %s1831_s4 = inlined_call_operand.vmem [shape: bf16[2,16,32], index: 4, kind: input, shape index: {}]   ;;  %s1832_s5 = inlined_call_operand.hbm [shape: f32[16,32], index: 5, kind: output, shape index: {}]  }
   0x1   :  { %v1581_v0 = vld [vmem:[%s1828_s1] sm:$0xff]   ;;  %1443 = vmatprep.subr.bf16.mxu0 %v1634_v1  ;;  %1451 = vmatprep.subr.bf16.mxu1 %v1634_v1  ;;  %v1582_v2 = vld [vmem:[%s1828_s1 + $0x10] sm:$0xff]   ;;  %v1583_v3 = vld [vmem:[%s1828_s1 + $0x8] sm:$0xff]  }
   0x2   :  { %1444 = vmatpush3.bf16.msra.mxu0 %v1581_v0  ;;  %1447 = vmatprep.mubr.msk.bf16.mxu0 %vm1635_vm0, %v1634_v1  ;;  %v1584_v4 = vld [vmem:[%s1828_s1 + $0x18] sm:$0xff]   ;;  %v1585_v5 = vld [vmem:[%s1827_s0] sm:$0xff]   ;;  %v1587_v7 = vld [vmem:[%s1829_s2 + $0x10] sm:$0xff]  }
   0x3   :  { %1452 = vmatpush3.bf16.msra.mxu1 %v1582_v2  ;;  %1445 = vmatprep.subr.bf16.mxu0 %v1634_v1  ;;  %v1586_v6 = vld [vmem:[%s1829_s2] sm:$0xff]   ;;  %v1588_v8 = vld [vmem:[%s1829_s2 + $0x8] sm:$0xff]   ;;  %v1589_v9 = vld [vmem:[%s1829_s2 + $0x18] sm:$0xff]  }
   0x4   :  { %1453 = vmatprep.subr.bf16.mxu1 %v1634_v1  ;;  %1455 = vmatprep.mubr.msk.bf16.mxu1 %vm1635_vm0, %v1634_v1 }
   0x6   :  { %1446 = vmatpush3.bf16.msra.mxu0 %v1583_v3 }
   0x7   :  { %1454 = vmatpush3.bf16.msra.mxu1 %v1584_v4  ;;  %1459 = vmatprep.subr.bf16.mxu0 %v1634_v1 }
   0x8   :  { %1467 = vmatprep.subr.bf16.mxu1 %v1634_v1 }
   0x9   :  { %1448 = vmatmul.mubr.msk.bf16.vlgmr.msra.gmra.mrb[0].mxu0 %vm45_vm1, %v1585_v5 }
   0xa   :  { %1456 = vmatmul.mubr.msk.bf16.vlgmr.msra.gmra.mrb[0].mxu1 %vm45_vm1, %v1585_v5  ;;  %1460 = vmatpush3.bf16.msra.mxu0 %v1586_v6 }
   0xb   :  { %1468 = vmatpush3.bf16.msra.mxu1 %v1587_v7  ;;  %1461 = vmatprep.subr.bf16.mxu0 %v1634_v1 }
   0xc   :  { %1469 = vmatprep.subr.bf16.mxu1 %v1634_v1  ;;  %1463 = vmatprep.mubr.msk.bf16.mxu0 %vm1635_vm0, %v1634_v1 }
   0xd   :  { %10 = vsyncpa [#allocation3], 0  ;;  %1471 = vmatprep.mubr.msk.bf16.mxu1 %vm1635_vm0, %v1634_v1  ;;  %v1590_v10 = vld [vmem:[%s1830_s3] sm:$0xff]   ;;  %v1591_v11 = vld [vmem:[%s1830_s3 + $0x10] sm:$0xff]   ;;  %vm378_vm2 = vcmask 130048   ;;  %vm455_vm3 = vcmask 64512  }
   0xe   :  { %1462 = vmatpush3.bf16.msra.mxu0 %v1588_v8  ;;  %v1593_v12 = vld [vmem:[%s1830_s3 + $0x18] sm:$0xff]   ;;  %v1592_v13 = vld [vmem:[%s1830_s3 + $0x8] sm:$0xff]   ;;  %v1636_v60 = vmov 0.0|0.0   ;;  %v1389_v0 = vld [vmem:[%s1831_s4] sm:$0xff]  }
   0xf   :  { %1470 = vmatpush3.bf16.msra.mxu1 %v1589_v9  ;;  %1475 = vmatprep.subr.bf16.mxu0 %v1634_v1  ;;  %v1396_v61 = vld [vmem:[%s1831_s4 + $0x8] sm:$0xff]   ;;  %s1637_s4 = smov [#allocation2]  }
  0x10   :  { %1483 = vmatprep.subr.bf16.mxu1 %v1634_v1  ;;  %s1328_s19 = sshll.u32 %s1637_s4, 4  ;;  %s1329_s19 = int_to_ptr.vmem [resolvable:$true] %s1328_s19 }
  0x11   :  { %1464 = vmatmul.mubr.msk.bf16.vlgmr.msra.gmra.mrb[4].mxu0 %vm45_vm1, %v1585_v5  ;;  %s1610_s20 = scalar_lea.vmem %s1329_s19, 256  ;;  %p1615_p1 = scmp.lt.s32.totalorder %s1329_s19, %s1329_s19 }
  0x12   :  { %1472 = vmatmul.mubr.msk.bf16.vlgmr.msra.gmra.mrb[4].mxu1 %vm45_vm1, %v1585_v5  ;;  %1476 = vmatpush3.bf16.msra.mxu0 %v1590_v10  ;;  %p1611_p0 = scmp.ne.s32.totalorder %s1329_s19, %s1610_s20  ;;  %p1616_p2 = scmp.lt.s32.totalorder %s1610_s20, %s1610_s20 }
  0x13   :  { %1484 = vmatpush3.bf16.msra.mxu1 %v1591_v11  ;;  %1477 = vmatprep.subr.bf16.mxu0 %v1634_v1 }
  0x14   :  { %1485 = vmatprep.subr.bf16.mxu1 %v1634_v1  ;;  %1479 = vmatprep.mubr.msk.bf16.mxu0 %vm1635_vm0, %v1634_v1  ;;  %p1617_p3 = por %p1616_p2, %p1615_p1 }
  0x15   :  { %1487 = vmatprep.mubr.msk.bf16.mxu1 %vm1635_vm0, %v1634_v1 }
  0x16   :  { %1478 = vmatpush3.bf16.msra.mxu0 %v1592_v13  ;;  %p1618_p4 = pnand %p1617_p3, %p1611_p0 }
  0x17   :  { %1486 = vmatpush3.bf16.msra.mxu1 %v1593_v12  ;;  %1501 = vmatprep.subr.mxu0 %v1634_v1 }
  0x18   :  { %1491 = vmatprep.subr.mxu1 %v1634_v1 }
  0x19   :  { %1480 = vmatmul.mubr.msk.bf16.vlgmr.msra.gmra.mrb[8].mxu0 %vm45_vm1, %v1585_v5 }
  0x1a   :  { %1488 = vmatmul.mubr.msk.bf16.vlgmr.msra.gmra.mrb[8].mxu1 %vm45_vm1, %v1585_v5  ;;  %1503 = vmatprep.mubr.msk.f32.mxu0 %vm1635_vm0, %v1634_v1 }
  0x1b   :  { %1493 = vmatprep.mubr.msk.f32.mxu1 %vm1635_vm0, %v1634_v1 }
  0xdc   :  { %v83_v14 = vpop.f32.mrb[0].mxu0 }
  0xdd   :  { %v1449_v15 = vpop.f32.mrb[1].mxu0  ;;  %v141_v16 = vpop.f32.mrb[0].mxu1 }
  0xde   :  { %v1745_v17 = vpop.f32.mrb[2].mxu0  ;;  %v1457_v18 = vpop.f32.mrb[1].mxu1 }
  0xdf   :  { %v1450_v19 = vpop.f32.mrb[3].mxu0  ;;  %v1747_v20 = vpop.f32.mrb[2].mxu1 }
  0xe0   :  { %v1458_v21 = vpop.f32.mrb[3].mxu1 }
  0xe4   :  { %v198_v22 = vpop.f32.mrb[4].mxu0 }
  0xe5   :  { %v256_v23 = vpop.f32.mrb[4].mxu1  ;;  %v1465_v24 = vpop.f32.mrb[5].mxu0  ;;  %1492 = vmatpush3.xpose.msk.msra.mxu1 %vm378_vm2, %v198_v22 }
  0xe6   :  { %1502 = vmatpush3.xpose.msk.msra.mxu0 %vm378_vm2, %v256_v23  ;;  %v201_v25 = vpop.f32.mrb[6].mxu0  ;;  %v1473_v26 = vpop.f32.mrb[5].mxu1  ;;  %1496 = vmatprep.subr.mxu1 %v1634_v1 }
  0xe7   :  { %v1466_v27 = vpop.f32.mrb[7].mxu0  ;;  %v1752_v28 = vpop.f32.mrb[6].mxu1  ;;  %1559 = vmatprep.subr.bf16.mxu0 %v1636_v60 }
  0xe8   :  { %v1474_v29 = vpop.f32.mrb[7].mxu1  ;;  %1494 = vmatmul.mubr.msk.f32.vlgmr.msra.gmra.mrb[12].mxu1 %vm378_vm2, %v83_v14 }
  0xe9   :  { %1504 = vmatmul.mubr.msk.f32.vlgmr.msra.gmra.mrb[12].mxu0 %vm378_vm2, %v141_v16  ;;  %1498 = vmatprep.mubr.msk.f32.mxu1 %vm1635_vm0, %v1634_v1 }
  0xea   :  { %1515 = vmatprep.mubr.msk.f32.mxu0 %vm1635_vm0, %v1634_v1  ;;  %1561 = vmatpush3.bf16.msra.mxu0 %v1396_v61 }
  0xeb   :  { %1562 = vmatprep.subr.bf16.mxu0 %v1636_v60 }
  0xec   :  { %v313_v33 = vpop.f32.mrb[8].mxu0 }
  0xed   :  { %v371_v30 = vpop.f32.mrb[8].mxu1  ;;  %v1481_v35 = vpop.f32.mrb[9].mxu0  ;;  %1497 = vmatpush3.msra.mxu1 %v313_v33 }
  0xee   :  { %v1489_v31 = vpop.f32.mrb[9].mxu1  ;;  %v316_v36 = vpop.f32.mrb[10].mxu0  ;;  %1506 = vmatprep.subr.mxu1 %v1634_v1 }
  0xef   :  { %v1760_v32 = vpop.f32.mrb[10].mxu1  ;;  %v1482_v37 = vpop.f32.mrb[11].mxu0 }
  0xf0   :  { %v1490_v34 = vpop.f32.mrb[11].mxu1 }
 0x1bb   :  { %v451_v38 = vpop.f32.mrb[12].mxu1 }
 0x1bc   :  { %v616_v39 = vpop.f32.mrb[12].mxu0  ;;  %v1495_v40 = vpop.f32.mrb[13].mxu1  ;;  %v456_v41 = vsel %vm455_vm3, %v451_v38, -inf }
 0x1bd   :  { %v1505_v42 = vpop.f32.mrb[13].mxu0  ;;  %457 = vmax.xlane.f32.xlu0 %v456_v41  ;;  %v620_v43 = vsel %vm455_vm3, %v616_v39, -inf }
 0x1c1   :  { %621 = vmax.xlane.f32.xlu0 %v620_v43 }
 0x24a   :  { %v458_v44 = vpop.xlane.xlu0 %457 }
 0x24b   :  { %v459_v45 = vsub.f32 %v451_v38, %v458_v44 }
 0x24d   :  { %v460_v46 = vmul.f32 1.442695, %v459_v45 }
 0x24e   :  { %v622_v47 = vpop.xlane.xlu0 %621 }
 0x24f   :  { %1594 = vpow2.f32 %v460_v46  ;;  %v623_v48 = vsub.f32 %v616_v39, %v622_v47 }
 0x251   :  { %v624_v49 = vmul.f32 1.442695, %v623_v48 }
 0x253   :  { %1596 = vpow2.f32 %v624_v49 }
 0x259   :  { %v1595_v50 = vpop.eup %1594 }
 0x25a   :  { %v462_v51 = vsel %vm455_vm3, %v1595_v50, 0.0 }
 0x25b   :  { %463 = vadd.xlane.f32.xlu1 %v462_v51 }
 0x25d   :  { %v1597_v52 = vpop.eup %1596 }
 0x25e   :  { %v626_v53 = vsel %vm455_vm3, %v1597_v52, 0.0 }
 0x25f   :  { %627 = vadd.xlane.f32.xlu1 %v626_v53 }
 0x2e8   :  { %v464_v54 = vpop.xlane.xlu1 %463 }
 0x2e9   :  { %1598 = vrcp.f32 %v464_v54 }
 0x2ec   :  { %v628_v55 = vpop.xlane.xlu1 %627 }
 0x2ed   :  { %1600 = vrcp.f32 %v628_v55 }
 0x2f3   :  { %v1599_v56 = vpop.eup %1598 }
 0x2f4   :  { %v466_v57 = vmul.f32 %v1599_v56, %v1595_v50 }
 0x2f6   :  { %1499 = vmatmul.mubr.msk.f32.vlgmr.msra.gmra.mrb[14].mxu1 %vm455_vm3, %v466_v57 }
 0x2f7   :  { %v1601_v58 = vpop.eup %1600  ;;  %1507 = vmatpush3.msra.mxu1 %v371_v30  ;;  %1508 = vmatprep.mubr.msk.f32.mxu1 %vm1635_vm0, %v1634_v1 }
 0x2f8   :  { %v630_v59 = vmul.f32 %v1601_v58, %v1597_v52  ;;  %1525 = vmatprep.subr.mxu1 %v1634_v1 }
 0x2fa   :  { %1509 = vmatmul.mubr.msk.f32.vlgmr.msra.gmra.mrb[16].mxu1 %vm455_vm3, %v630_v59 }
 0x2fb   :  { %1527 = vmatprep.mubr.msk.f32.mxu1 %vm1635_vm0, %v1634_v1 }
 0x2fe   :  { %1526 = vmatpush3.xpose.msk.msra.mxu1 %vm378_vm2, %v201_v25 }
 0x2ff   :  { %1530 = vmatprep.subr.mxu1 %v1634_v1 }
 0x301   :  { %1528 = vmatmul.mubr.msk.f32.vlgmr.msra.gmra.mrb[18].mxu1 %vm378_vm2, %v1745_v17 }
 0x302   :  { %1531 = vmatpush3.msra.mxu1 %v316_v36  ;;  %1532 = vmatprep.mubr.msk.f32.mxu1 %vm1635_vm0, %v1634_v1 }
 0x303   :  { %1540 = vmatprep.subr.mxu1 %v1634_v1 }
 0x3c9   :  { %v536_v62 = vpop.f32.mrb[14].mxu1 }
 0x3ca   :  { %v1500_v63 = vpop.f32.mrb[15].mxu1 }
 0x3cd   :  { %v700_v2 = vpop.f32.mrb[16].mxu1 }
 0x3ce   :  { %v1510_v3 = vpop.f32.mrb[17].mxu1  ;;  %1516 = vmatmul.mubr.msk.f32.vlgmr.msra.gmra.mrb[14].mxu0 %vm378_vm2, %v700_v2 }
 0x3cf   :  { %1564 = vmatpush3.bf16.msra.mxu0 %v1389_v0  ;;  %1522 = vmatprep.mubr.msk.f32.mxu0 %vm1635_vm0, %v1634_v1 }
 0x3d0   :  { %1535 = vmatprep.subr.mxu0 %v1634_v1 }
 0x3d4   :  { %v927_v4 = vpop.f32.mrb[18].mxu1 }
 0x3d5   :  { %v1529_v5 = vpop.f32.mrb[19].mxu1  ;;  %v931_v6 = vsel %vm455_vm3, %v927_v4, -inf }
 0x3d6   :  { %932 = vmax.xlane.f32.xlu0 %v931_v6  ;;  %1523 = vmatmul.mubr.msk.f32.vlgmr.msra.gmra.mrb[14].mxu0 %vm378_vm2, %v536_v62 }
 0x3d7   :  { %1537 = vmatprep.mubr.msk.f32.mxu0 %vm1635_vm0, %v1634_v1 }
 0x3d8   :  { %1536 = vmatpush3.xpose.msk.msra.mxu0 %vm378_vm2, %v1752_v28 }
 0x3d9   :  { %1565 = vmatprep.subr.bf16.mxu0 %v1636_v60 }
 0x3db   :  { %1538 = vmatmul.mubr.msk.f32.vlgmr.msra.gmra.mrb[16].mxu0 %vm378_vm2, %v1747_v20 }
 0x3dc   :  { %1567 = vmatpush3.bf16.msra.mxu0 %v1396_v61  ;;  %1549 = vmatprep.mubr.msk.f32.mxu0 %vm1635_vm0, %v1634_v1 }
 0x3dd   :  { %1568 = vmatprep.subr.bf16.mxu0 %v1636_v60 }
 0x463   :  { %v933_v7 = vpop.xlane.xlu0 %932 }
 0x464   :  { %v934_v8 = vsub.f32 %v927_v4, %v933_v7 }
 0x466   :  { %v935_v9 = vmul.f32 1.442695, %v934_v8 }
 0x468   :  { %1602 = vpow2.f32 %v935_v9 }
 0x472   :  { %v1603_v10 = vpop.eup %1602 }
 0x473   :  { %v937_v11 = vsel %vm455_vm3, %v1603_v10, 0.0 }
 0x474   :  { %938 = vadd.xlane.f32.xlu0 %v937_v11 }
 0x4a9   :  { %v851_v12 = vpop.f32.mrb[14].mxu0 }
 0x4aa   :  { %1321 = vst.msk [vmem:[#allocation2] sm:$0xff] %vm45_vm1, %v851_v12  ;;  %v1524_v13 = vpop.f32.mrb[15].mxu0 }
 0x4ae   :  { %v1087_v14 = vpop.f32.mrb[16].mxu0 }
 0x4af   :  { %v1539_v15 = vpop.f32.mrb[17].mxu0  ;;  %v1091_v16 = vsel %vm455_vm3, %v1087_v14, -inf }
 0x4b0   :  { %1092 = vmax.xlane.f32.xlu1 %v1091_v16 }
 0x501   :  { %v939_v17 = vpop.xlane.xlu0 %938 }
 0x502   :  { %1604 = vrcp.f32 %v939_v17 }
 0x50c   :  { %v1605_v18 = vpop.eup %1604 }
 0x50d   :  { %v941_v19 = vmul.f32 %v1605_v18, %v1603_v10 }
 0x50f   :  { %1533 = vmatmul.mubr.msk.f32.vlgmr.msra.gmra.mrb[20].mxu1 %vm455_vm3, %v941_v19 }
 0x510   :  { %1541 = vmatpush3.msra.mxu1 %v1760_v32  ;;  %1542 = vmatprep.mubr.msk.f32.mxu1 %vm1635_vm0, %v1634_v1 }
 0x53d   :  { %v1093_v20 = vpop.xlane.xlu1 %1092 }
 0x53e   :  { %v1094_v21 = vsub.f32 %v1087_v14, %v1093_v20 }
 0x540   :  { %v1095_v22 = vmul.f32 1.442695, %v1094_v21 }
 0x542   :  { %1606 = vpow2.f32 %v1095_v22 }
 0x54c   :  { %v1607_v23 = vpop.eup %1606 }
 0x54d   :  { %v1097_v24 = vsel %vm455_vm3, %v1607_v23, 0.0 }
 0x54e   :  { %1098 = vadd.xlane.f32.xlu1 %v1097_v24 }
 0x5db   :  { %v1099_v25 = vpop.xlane.xlu1 %1098 }
 0x5dc   :  { %1608 = vrcp.f32 %v1099_v25 }
 0x5e2   :  { %v1011_v26 = vpop.f32.mrb[20].mxu1 }
 0x5e3   :  { %v1534_v27 = vpop.f32.mrb[21].mxu1 }
 0x5e6   :  { %v1609_v28 = vpop.eup %1608 }
 0x5e7   :  { %v1101_v29 = vmul.f32 %v1609_v28, %v1607_v23 }
 0x5e9   :  { %1543 = vmatmul.mubr.msk.f32.vlgmr.msra.gmra.mrb[22].mxu1 %vm455_vm3, %v1101_v29 }
 0x6bc   :  { %v1171_v30 = vpop.f32.mrb[22].mxu1 }
 0x6bd   :  { %v1544_v31 = vpop.f32.mrb[23].mxu1  ;;  %1550 = vmatmul.mubr.msk.f32.vlgmr.msra.gmra.mrb[18].mxu0 %vm378_vm2, %v1171_v30 }
 0x6be   :  { %1570 = vmatpush3.bf16.msra.mxu0 %v1389_v0  ;;  %1556 = vmatprep.mubr.msk.f32.mxu0 %vm1635_vm0, %v1634_v1 }
 0x6c5   :  { %1557 = vmatmul.mubr.msk.f32.vlgmr.msra.gmra.mrb[18].mxu0 %vm378_vm2, %v1011_v26 }
 0x798   :  { %v1317_v32 = vpop.f32.mrb[18].mxu0 }
 0x799   :  { %1322 = vst.msk [vmem:[#allocation2 + $0x8] sm:$0xff] %vm45_vm1, %v1317_v32  ;;  %v1558_v33 = vpop.f32.mrb[19].mxu0 }
 0x79a   :  { %1621 = shalt.err (!%p1618_p4)
}
 0x79b   :  { %s1622_s23 = scalar_lea.hbm %s1832_s5, 256 }
 0x79c   :  { %p1623_p5 = scmp.ne.s32.totalorder %s1832_s5, %s1622_s23  ;;  %p1626_p6 = scmp.lt.u32.totalorder %s1622_s23, %s1832_s5 }
 0x79e   :  { %p1628_p7 = pnand %p1626_p6, %p1623_p5 }
 0x7a0   :  { %1631 = shalt.err (!%p1628_p7)
}
 0x7a1   :  { %s1638_s28 = smov 128   ;;  %s1639_s29 = smov 8  }
 0x7a2   :  { %1334 = dma.vmem_to_hbm [thread:$0]  %s1329_s19, 256, %s1832_s5, [#allocation3], %s1638_s28, %s1638_s28, %s1639_s29  }
 0x7a3   :  { %1632 = dma.done.wait [#allocation3], 256  }
 0x7a4   :  { %1633 = vsyncadd [#allocation3], 4294967040 }
 0x7a5   :  { %1338 = vsyncpa [#allocation3], 1 }

</bundles_post_ra>
